<compile_context>
chip_gen: v7x
topology: tpu7x:2x2x1
jax: 0.10.0
libtpu: 0.0.40
codegen_flags: <defaults>
</compile_context>

<pallas_src>
import functools

import jax
import jax.numpy as jnp
from jax.experimental import pallas as pl
from jax.experimental.pallas import tpu as pltpu


def _round_up(n, m):
    return (n + m - 1) // m * m


def rnn_kernel(xin_ref, wh_ref, wo_ref, out_ref, *, seq_len, batch_p, vocab):
    """Single-invocation kernel: sigmoid recurrence + hoisted output projection + log-softmax.

    xin_ref : (S*Bp, H)   precomputed input projections (embeddings @ W_x + b_x + b_h, gathered)
    wh_ref  : (H, H)      recurrent weights
    wo_ref  : (H, Vp)     output projection, zero-padded columns beyond `vocab`
    out_ref : (S*Bp, Vp)  log-softmax over the (padded) vocab axis; padded lanes hold -inf
    """
    wh = wh_ref[...]

    # t = 0: h starts at zero, so h @ W_h == 0 -> skip the MXU op on the critical serial path.
    h = jax.nn.sigmoid(xin_ref[0:batch_p, :])
    hs = [h]

    # Remaining steps: only the (Bp,H)x(H,H) matmul + sigmoid (lax.logistic -> EUP slot) sit on
    # the serial dependence chain. Static tiny trip count -> fully unrolled, static slices.
    for t in range(1, seq_len):
        pre = xin_ref[t * batch_p:(t + 1) * batch_p, :] + jnp.dot(
            h, wh, preferred_element_type=jnp.float32)
        h = jax.nn.sigmoid(pre)
        hs.append(h)

    # Hidden states never touch VMEM scratch: concatenate in vregs and do one batched MXU matmul.
    total_h = jnp.concatenate(hs, axis=0)                          # (S*Bp, H)
    logits = jnp.dot(total_h, wo_ref[...], preferred_element_type=jnp.float32)  # (S*Bp, Vp)

    # Mask the zero-padded vocab lanes to -inf so they contribute nothing to the logsumexp.
    col = jax.lax.broadcasted_iota(jnp.int32, logits.shape, 1)
    logits = jnp.where(col < vocab, logits, -jnp.inf)

    m = jnp.max(logits, axis=-1, keepdims=True)
    lse = m + jnp.log(jnp.sum(jnp.exp(logits - m), axis=-1, keepdims=True))
    out_ref[...] = logits - lse                                    # one full, lane-dense store


def rnn_forward(x_tokens, embeddings, W_x, b_x, W_h, b_h, W_out):
    S, B = x_tokens.shape
    H = W_x.shape[1]
    V = W_out.shape[1]

    Bp = _round_up(B, 8)        # sublane-aligned batch
    Vp = _round_up(V, 128)      # lane-dense output width

    f32 = jnp.float32

    # Hoisted input path (plain-JAX glue, one shot): the x-path is linear and token-indexed, so
    # a (vocab, H) projection table + gather replaces S per-step (B,E)x(E,H) matmuls; both
    # biases are folded into the table. Batch padded with token 0 (padded rows sliced off later).
    proj_table = jnp.dot(embeddings.astype(f32), W_x.astype(f32)) + (b_x + b_h).astype(f32)
    x_pad = jnp.pad(x_tokens, ((0, 0), (0, Bp - B)))               # (S, Bp)
    xin = jnp.take(proj_table, x_pad.reshape(-1), axis=0)          # (S*Bp, H), row-major (t, b)

    # Zero-pad W_out columns to the lane-dense width (masked to -inf inside the kernel).
    W_out_p = jnp.pad(W_out.astype(f32), ((0, 0), (0, Vp - V)))    # (H, Vp)

    kernel = functools.partial(rnn_kernel, seq_len=S, batch_p=Bp, vocab=V)

    out_flat = pl.pallas_call(
        kernel,
        out_shape=jax.ShapeDtypeStruct((S * Bp, Vp), f32),
        in_specs=[
            pl.BlockSpec(memory_space=pltpu.MemorySpace.VMEM),     # xin     (S*Bp, H)
            pl.BlockSpec(memory_space=pltpu.MemorySpace.VMEM),     # W_h     (H, H)
            pl.BlockSpec(memory_space=pltpu.MemorySpace.VMEM),     # W_out_p (H, Vp)
        ],
        out_specs=pl.BlockSpec(memory_space=pltpu.MemorySpace.VMEM),
    )(xin, W_h.astype(f32), W_out_p)

    # Drop batch / vocab padding.
    return out_flat.reshape(S, Bp, Vp)[:, :B, :V]


def rnn_forward_ref(x_tokens, embeddings, W_x, b_x, W_h, b_h, W_out):
    """Pure-JAX reference mirroring the PyTorch forward (no hoisting, no padding)."""
    S, B = x_tokens.shape
    H = W_x.shape[1]
    enc = jnp.take(embeddings, x_tokens, axis=0)
    h = jnp.zeros((B, H), jnp.float32)
    hs = []
    for t in range(S):
        a = enc[t] @ W_x + b_x
        b = h @ W_h + b_h
        h = jax.nn.sigmoid(a + b)
        hs.append(h)
    total_h = jnp.stack(hs, axis=0)                                # (S, B, H)
    logits = total_h @ W_out                                       # (S, B, V)
    m = jnp.max(logits, axis=2, keepdims=True)
    lse = m + jnp.log(jnp.sum(jnp.exp(logits - m), axis=2, keepdims=True))
    return logits - lse


if __name__ == "__main__":
    vocab_size = 32
    hidden_size = 16
    embedding_size = 32
    seq_len = 8
    batch = 2

    key = jax.random.PRNGKey(0)
    k_emb, k_wx, k_bx, k_wh, k_bh, k_out, k_x = jax.random.split(key, 7)

    embeddings = jax.random.normal(k_emb, (vocab_size, embedding_size), jnp.float32)
    W_x = jax.random.normal(k_wx, (embedding_size, hidden_size), jnp.float32)
    b_x = jax.random.normal(k_bx, (hidden_size,), jnp.float32)
    W_h = jax.random.normal(k_wh, (hidden_size, hidden_size), jnp.float32)
    b_h = jax.random.normal(k_bh, (hidden_size,), jnp.float32)
    W_out = jax.random.normal(k_out, (hidden_size, vocab_size), jnp.float32)

    x_tokens = jax.random.randint(k_x, (seq_len, batch), 0, vocab_size, jnp.int32)

    out = rnn_forward(x_tokens, embeddings, W_x, b_x, W_h, b_h, W_out)
    out = jax.block_until_ready(out)

    ref = rnn_forward_ref(x_tokens, embeddings, W_x, b_x, W_h, b_h, W_out)
    assert out.shape == (seq_len, batch, vocab_size)
    assert jnp.allclose(out, ref, atol=1e-4, rtol=1e-4), "mismatch vs pure-JAX reference"

    print("KERNEL_OK")
</pallas_src>

<mosaic_0001>
module attributes {stable_mosaic.version = 11 : i64} {
  func.func @rnn_kernel(%arg0: memref<64x16xf32, #tpu.memory_space<vmem>>, %arg1: memref<16x16xf32, #tpu.memory_space<vmem>>, %arg2: memref<16x128xf32, #tpu.memory_space<vmem>>, %arg3: memref<64x128xf32, #tpu.memory_space<vmem>>) attributes {dimension_semantics = [], scalar_prefetch = 0 : i64, scratch_operands = 0 : i64, tpu.core_type = #tpu.core_type<tc>} {
    %c0 = arith.constant 0 : index
    %c0_0 = arith.constant 0 : index
    %0 = vector.load %arg1[%c0, %c0_0] : memref<16x16xf32, #tpu.memory_space<vmem>>, vector<16x16xf32>
    %c0_1 = arith.constant 0 : index
    %c0_2 = arith.constant 0 : index
    %1 = vector.load %arg0[%c0_1, %c0_2] : memref<64x16xf32, #tpu.memory_space<vmem>>, vector<8x16xf32>
    %2 = arith.negf %1 : vector<8x16xf32>
    %3 = math.exp %2 : vector<8x16xf32>
    %cst = arith.constant 1.000000e+00 : f32
    %4 = vector.broadcast %cst : f32 to vector<8x16xf32>
    %5 = arith.addf %4, %3 : vector<8x16xf32>
    %6 = arith.divf %4, %5 : vector<8x16xf32>
    %c8 = arith.constant 8 : index
    %c0_3 = arith.constant 0 : index
    %7 = vector.load %arg0[%c8, %c0_3] : memref<64x16xf32, #tpu.memory_space<vmem>>, vector<8x16xf32>
    %cst_4 = arith.constant dense<0.000000e+00> : vector<8x16xf32>
    %8 = tpu.matmul %6, %0, %cst_4 {dimension_numbers = #tpu.dot_dimension_numbers<[1], [0], [0], [1], [0, 0, 1, 1], [], []>} : vector<8x16xf32>, vector<16x16xf32>, vector<8x16xf32> -> vector<8x16xf32>
    %9 = arith.addf %7, %8 : vector<8x16xf32>
    %10 = arith.negf %9 : vector<8x16xf32>
    %11 = math.exp %10 : vector<8x16xf32>
    %cst_5 = arith.constant 1.000000e+00 : f32
    %12 = vector.broadcast %cst_5 : f32 to vector<8x16xf32>
    %13 = arith.addf %12, %11 : vector<8x16xf32>
    %14 = arith.divf %12, %13 : vector<8x16xf32>
    %c16 = arith.constant 16 : index
    %c0_6 = arith.constant 0 : index
    %15 = vector.load %arg0[%c16, %c0_6] : memref<64x16xf32, #tpu.memory_space<vmem>>, vector<8x16xf32>
    %cst_7 = arith.constant dense<0.000000e+00> : vector<8x16xf32>
    %16 = tpu.matmul %14, %0, %cst_7 {dimension_numbers = #tpu.dot_dimension_numbers<[1], [0], [0], [1], [0, 0, 1, 1], [], []>} : vector<8x16xf32>, vector<16x16xf32>, vector<8x16xf32> -> vector<8x16xf32>
    %17 = arith.addf %15, %16 : vector<8x16xf32>
    %18 = arith.negf %17 : vector<8x16xf32>
    %19 = math.exp %18 : vector<8x16xf32>
    %cst_8 = arith.constant 1.000000e+00 : f32
    %20 = vector.broadcast %cst_8 : f32 to vector<8x16xf32>
    %21 = arith.addf %20, %19 : vector<8x16xf32>
    %22 = arith.divf %20, %21 : vector<8x16xf32>
    %c24 = arith.constant 24 : index
    %c0_9 = arith.constant 0 : index
    %23 = vector.load %arg0[%c24, %c0_9] : memref<64x16xf32, #tpu.memory_space<vmem>>, vector<8x16xf32>
    %cst_10 = arith.constant dense<0.000000e+00> : vector<8x16xf32>
    %24 = tpu.matmul %22, %0, %cst_10 {dimension_numbers = #tpu.dot_dimension_numbers<[1], [0], [0], [1], [0, 0, 1, 1], [], []>} : vector<8x16xf32>, vector<16x16xf32>, vector<8x16xf32> -> vector<8x16xf32>
    %25 = arith.addf %23, %24 : vector<8x16xf32>
    %26 = arith.negf %25 : vector<8x16xf32>
    %27 = math.exp %26 : vector<8x16xf32>
    %cst_11 = arith.constant 1.000000e+00 : f32
    %28 = vector.broadcast %cst_11 : f32 to vector<8x16xf32>
    %29 = arith.addf %28, %27 : vector<8x16xf32>
    %30 = arith.divf %28, %29 : vector<8x16xf32>
    %c32 = arith.constant 32 : index
    %c0_12 = arith.constant 0 : index
    %31 = vector.load %arg0[%c32, %c0_12] : memref<64x16xf32, #tpu.memory_space<vmem>>, vector<8x16xf32>
    %cst_13 = arith.constant dense<0.000000e+00> : vector<8x16xf32>
    %32 = tpu.matmul %30, %0, %cst_13 {dimension_numbers = #tpu.dot_dimension_numbers<[1], [0], [0], [1], [0, 0, 1, 1], [], []>} : vector<8x16xf32>, vector<16x16xf32>, vector<8x16xf32> -> vector<8x16xf32>
    %33 = arith.addf %31, %32 : vector<8x16xf32>
    %34 = arith.negf %33 : vector<8x16xf32>
    %35 = math.exp %34 : vector<8x16xf32>
    %cst_14 = arith.constant 1.000000e+00 : f32
    %36 = vector.broadcast %cst_14 : f32 to vector<8x16xf32>
    %37 = arith.addf %36, %35 : vector<8x16xf32>
    %38 = arith.divf %36, %37 : vector<8x16xf32>
    %c40 = arith.constant 40 : index
    %c0_15 = arith.constant 0 : index
    %39 = vector.load %arg0[%c40, %c0_15] : memref<64x16xf32, #tpu.memory_space<vmem>>, vector<8x16xf32>
    %cst_16 = arith.constant dense<0.000000e+00> : vector<8x16xf32>
    %40 = tpu.matmul %38, %0, %cst_16 {dimension_numbers = #tpu.dot_dimension_numbers<[1], [0], [0], [1], [0, 0, 1, 1], [], []>} : vector<8x16xf32>, vector<16x16xf32>, vector<8x16xf32> -> vector<8x16xf32>
    %41 = arith.addf %39, %40 : vector<8x16xf32>
    %42 = arith.negf %41 : vector<8x16xf32>
    %43 = math.exp %42 : vector<8x16xf32>
    %cst_17 = arith.constant 1.000000e+00 : f32
    %44 = vector.broadcast %cst_17 : f32 to vector<8x16xf32>
    %45 = arith.addf %44, %43 : vector<8x16xf32>
    %46 = arith.divf %44, %45 : vector<8x16xf32>
    %c48 = arith.constant 48 : index
    %c0_18 = arith.constant 0 : index
    %47 = vector.load %arg0[%c48, %c0_18] : memref<64x16xf32, #tpu.memory_space<vmem>>, vector<8x16xf32>
    %cst_19 = arith.constant dense<0.000000e+00> : vector<8x16xf32>
    %48 = tpu.matmul %46, %0, %cst_19 {dimension_numbers = #tpu.dot_dimension_numbers<[1], [0], [0], [1], [0, 0, 1, 1], [], []>} : vector<8x16xf32>, vector<16x16xf32>, vector<8x16xf32> -> vector<8x16xf32>
    %49 = arith.addf %47, %48 : vector<8x16xf32>
    %50 = arith.negf %49 : vector<8x16xf32>
    %51 = math.exp %50 : vector<8x16xf32>
    %cst_20 = arith.constant 1.000000e+00 : f32
    %52 = vector.broadcast %cst_20 : f32 to vector<8x16xf32>
    %53 = arith.addf %52, %51 : vector<8x16xf32>
    %54 = arith.divf %52, %53 : vector<8x16xf32>
    %c56 = arith.constant 56 : index
    %c0_21 = arith.constant 0 : index
    %55 = vector.load %arg0[%c56, %c0_21] : memref<64x16xf32, #tpu.memory_space<vmem>>, vector<8x16xf32>
    %cst_22 = arith.constant dense<0.000000e+00> : vector<8x16xf32>
    %56 = tpu.matmul %54, %0, %cst_22 {dimension_numbers = #tpu.dot_dimension_numbers<[1], [0], [0], [1], [0, 0, 1, 1], [], []>} : vector<8x16xf32>, vector<16x16xf32>, vector<8x16xf32> -> vector<8x16xf32>
    %57 = arith.addf %55, %56 : vector<8x16xf32>
    %58 = arith.negf %57 : vector<8x16xf32>
    %59 = math.exp %58 : vector<8x16xf32>
    %cst_23 = arith.constant 1.000000e+00 : f32
    %60 = vector.broadcast %cst_23 : f32 to vector<8x16xf32>
    %61 = arith.addf %60, %59 : vector<8x16xf32>
    %62 = arith.divf %60, %61 : vector<8x16xf32>
    %63 = tpu.concatenate %6, %14, %22, %30, %38, %46, %54, %62 in 0 : vector<8x16xf32>, vector<8x16xf32>, vector<8x16xf32>, vector<8x16xf32>, vector<8x16xf32>, vector<8x16xf32>, vector<8x16xf32>, vector<8x16xf32> -> vector<64x16xf32>
    %c0_24 = arith.constant 0 : index
    %c0_25 = arith.constant 0 : index
    %64 = vector.load %arg2[%c0_24, %c0_25] : memref<16x128xf32, #tpu.memory_space<vmem>>, vector<16x128xf32>
    %cst_26 = arith.constant dense<0.000000e+00> : vector<64x128xf32>
    %65 = tpu.matmul %63, %64, %cst_26 {dimension_numbers = #tpu.dot_dimension_numbers<[1], [0], [0], [1], [0, 0, 1, 1], [], []>} : vector<64x16xf32>, vector<16x128xf32>, vector<64x128xf32> -> vector<64x128xf32>
    %66 = tpu.iota {dimensions = array<i32: 1>} : vector<64x128xi32>
    %c32_i32 = arith.constant 32 : i32
    %67 = vector.broadcast %c32_i32 : i32 to vector<64x128xi32>
    %68 = arith.cmpi slt, %66, %67 : vector<64x128xi32>
    %cst_27 = arith.constant 0xFF800000 : f32
    %69 = vector.broadcast %cst_27 : f32 to vector<64x128xf32>
    %70 = arith.select %68, %65, %69 : vector<64x128xi1>, vector<64x128xf32>
    %cst_28 = arith.constant dense<0xFF800000> : vector<64xf32>
    %71 = vector.multi_reduction <maximumf>, %70, %cst_28 [1] : vector<64x128xf32> to vector<64xf32>
    %72 = vector.shape_cast %71 : vector<64xf32> to vector<64x1xf32>
    %73 = vector.broadcast %72 : vector<64x1xf32> to vector<64x128xf32>
    %74 = arith.subf %70, %73 : vector<64x128xf32>
    %75 = math.exp %74 : vector<64x128xf32>
    %cst_29 = arith.constant dense<0.000000e+00> : vector<64xf32>
    %76 = vector.multi_reduction <add>, %75, %cst_29 [1] : vector<64x128xf32> to vector<64xf32>
    %77 = vector.shape_cast %76 : vector<64xf32> to vector<64x1xf32>
    %78 = math.log %77 : vector<64x1xf32>
    %79 = arith.addf %72, %78 : vector<64x1xf32>
    %80 = vector.broadcast %79 : vector<64x1xf32> to vector<64x128xf32>
    %81 = arith.subf %70, %80 : vector<64x128xf32>
    %c0_30 = arith.constant 0 : index
    %c0_31 = arith.constant 0 : index
    %82 = vector.load %arg3[%c0_30, %c0_31] : memref<64x128xf32, #tpu.memory_space<vmem>>, vector<64x128xf32>
    tpu.vector_store %arg3[%c0_30, %c0_31], %81 {strides = array<i32>} : memref<64x128xf32, #tpu.memory_space<vmem>>, vector<64x128xf32>,
    return
  }
}

</mosaic_0001>

<bundles_post_ra>
// kernel: tpu_custom_call.1
= control target key start
LH: loop header
LB: loop body
LE: loop exit
PB: predicated region body
PF: predicated region fallthrough
CT: control target
= control target key end

     0   :  { %v1063_v3 = vmov 0.0|0.0   ;;  %vm1064_vm0 = vmmov 0   ;;  %v1065_v5 = vmov 0.0   ;;  %s1266_s0 = inlined_call_operand.vmem [shape: f32[64,16], index: 0, kind: input, shape index: {}]   ;;  %s1267_s1 = inlined_call_operand.vmem [shape: f32[16,16], index: 1, kind: input, shape index: {}]   ;;  %s1268_s2 = inlined_call_operand.vmem [shape: f32[16,128], index: 2, kind: input, shape index: {}]   ;;  %s1269_s3 = inlined_call_operand.hbm [shape: f32[64,128], index: 3, kind: output, shape index: {}]  }
   0x1   :  { %v15_v0 = vld [vmem:[%s1267_s1] sm:$0xff]  ;;  %v16_v1 = vld [vmem:[%s1267_s1 + $0x8] sm:$0xff]  ;;  %944 = vmatprep.subr.bf16.mxu0 %v1063_v3  ;;  %883 = vmatprep.mubr.msk.f32.mxu0 %vm1064_vm0, %v1065_v5 }
   0x2   :  { %v17_v2 = vld [vmem:[%s1266_s0] sm:$0xff]  ;;  %v1098_v4 = vpack.c.bf16 %v16_v1, %v15_v0 }
   0x3   :  { %v825_v6 = vmul.f32 -1.442695, %v17_v2 }
   0x4   :  { %8 = vsyncpa [#allocation3], 0  ;;  %953 = vmatprep.subr.bf16.mxu1 %v1063_v3  ;;  %904 = vmatprep.mubr.msk.f32.mxu1 %vm1064_vm0, %v1065_v5  ;;  %vm25_vm1 = vcmask 130048   ;;  %v24_v10 = vld [vmem:[%s1266_s0 + $0x8] sm:$0xff]  ;;  %v106_v18 = vld [vmem:[%s1266_s0 + $0x10] sm:$0xff]  ;;  %v702_v53 = vlaneseq }
   0x5   :  { %946 = vmatpush3.bf16.msra.mxu0 %v1098_v4  ;;  %975 = vpow2.f32 %v825_v6  ;;  %955 = vmatpush3.bf16.msra.mxu1 %v1098_v4  ;;  %v187_v26 = vld [vmem:[%s1266_s0 + $0x18] sm:$0xff]  ;;  %v268_v34 = vld [vmem:[%s1266_s0 + $0x20] sm:$0xff]  ;;  %v593_v43 = vld [vmem:[%s1268_s2 + $0x8] sm:$0xff] }
   0x6   :  { %947 = vmatprep.subr.bf16.mxu0 %v1063_v3  ;;  %959 = vmatprep.subr.bf16.mxu1 %v1063_v3  ;;  %v592_v42 = vld [vmem:[%s1268_s2] sm:$0xff]  ;;  %v349_v45 = vld [vmem:[%s1266_s0 + $0x28] sm:$0xff]  ;;  %v430_v54 = vld [vmem:[%s1266_s0 + $0x30] sm:$0xff]  ;;  %v1161_v55 = vand.u32 127, %v702_v53 }
   0x7   :  { %v965_v44 = vpack.c.bf16 %v593_v43, %v592_v42 }
   0x8   :  { %vm704_vm2 = vcmp.lt.s32.totalorder %v1161_v55, 32 }
   0xf   :  { %v976_v7 = vpop.eup %975 }
  0x10   :  { %v21_v8 = vadd.f32 1.0, %v976_v7 }
  0x12   :  { %977 = vrcp.f32 %v21_v8 }
  0x1c   :  { %v1106_v9 = vpop.eup %977 }
  0x1d   :  { %884 = vmatmul.mubr.msk.f32.vlgmr.msra.gmra.mrb[0].mxu0 %vm25_vm1, %v1106_v9 }
  0x1e   :  { %949 = vmatpush3.bf16.msra.mxu0 %v1098_v4  ;;  %890 = vmatprep.mubr.msk.f32.mxu0 %vm1064_vm0, %v1065_v5 }
  0x1f   :  { %950 = vmatprep.subr.bf16.mxu0 %v1063_v3 }
  0xf0   :  { %v95_v11 = vpop.f32.mrb[0].mxu0 }
  0xf1   :  { %v99_v12 = vadd.f32 %v95_v11, %v24_v10  ;;  %v885_v13 = vpop.f32.mrb[1].mxu0  ;;  %v511_v11 = vld [vmem:[%s1266_s0 + $0x38] sm:$0xff]  ;;  %s1066_s0 = smov [#allocation2]  }
  0xf2   :  { %s814_s7 = sshll.u32 %s1066_s0, 4  ;;  %s815_s7 = int_to_ptr.vmem [resolvable:$true] %s814_s7 }
  0xf3   :  { %v827_v14 = vmul.f32 -1.442695, %v99_v12  ;;  %s1039_s8 = scalar_lea.vmem %s815_s7, 1024  ;;  %p1044_p1 = scmp.lt.s32.totalorder %s815_s7, %s815_s7 }
  0xf4   :  { %p1040_p0 = scmp.ne.s32.totalorder %s815_s7, %s1039_s8  ;;  %p1045_p2 = scmp.lt.s32.totalorder %s1039_s8, %s1039_s8 }
  0xf5   :  { %979 = vpow2.f32 %v827_v14 }
  0xf6   :  { %p1046_p3 = por %p1045_p2, %p1044_p1 }
  0xf8   :  { %p1047_p4 = pnand %p1046_p3, %p1040_p0 }
  0xff   :  { %v980_v15 = vpop.eup %979 }
 0x100   :  { %v103_v16 = vadd.f32 1.0, %v980_v15 }
 0x102   :  { %981 = vrcp.f32 %v103_v16 }
 0x10c   :  { %v982_v17 = vpop.eup %981 }
 0x10d   :  { %891 = vmatmul.mubr.msk.f32.vlgmr.msra.gmra.mrb[2].mxu0 %vm25_vm1, %v982_v17 }
 0x10e   :  { %952 = vmatpush3.bf16.msra.mxu0 %v1098_v4  ;;  %897 = vmatprep.mubr.msk.f32.mxu0 %vm1064_vm0, %v1065_v5 }
 0x10f   :  { %956 = vmatprep.subr.bf16.mxu0 %v1063_v3 }
 0x1e0   :  { %v176_v19 = vpop.f32.mrb[2].mxu0 }
 0x1e1   :  { %v180_v20 = vadd.f32 %v176_v19, %v106_v18  ;;  %v892_v21 = vpop.f32.mrb[3].mxu0 }
 0x1e3   :  { %v829_v22 = vmul.f32 -1.442695, %v180_v20 }
 0x1e5   :  { %983 = vpow2.f32 %v829_v22 }
 0x1ef   :  { %v984_v23 = vpop.eup %983 }
 0x1f0   :  { %v184_v24 = vadd.f32 1.0, %v984_v23 }
 0x1f2   :  { %985 = vrcp.f32 %v184_v24 }
 0x1fc   :  { %v986_v25 = vpop.eup %985 }
 0x1fd   :  { %898 = vmatmul.mubr.msk.f32.vlgmr.msra.gmra.mrb[4].mxu0 %vm25_vm1, %v986_v25 }
 0x1fe   :  { %958 = vmatpush3.bf16.msra.mxu0 %v1098_v4  ;;  %911 = vmatprep.mubr.msk.f32.mxu0 %vm1064_vm0, %v1065_v5 }
 0x1ff   :  { %962 = vmatprep.subr.bf16.mxu0 %v1063_v3 }
 0x2d0   :  { %v257_v27 = vpop.f32.mrb[4].mxu0 }
 0x2d1   :  { %v261_v28 = vadd.f32 %v257_v27, %v187_v26  ;;  %v899_v29 = vpop.f32.mrb[5].mxu0 }
 0x2d3   :  { %v831_v30 = vmul.f32 -1.442695, %v261_v28 }
 0x2d5   :  { %987 = vpow2.f32 %v831_v30 }
 0x2df   :  { %v988_v31 = vpop.eup %987 }
 0x2e0   :  { %v265_v32 = vadd.f32 1.0, %v988_v31 }
 0x2e2   :  { %989 = vrcp.f32 %v265_v32 }
 0x2ec   :  { %v990_v33 = vpop.eup %989 }
 0x2ed   :  { %905 = vmatmul.mubr.msk.f32.vlgmr.msra.gmra.mrb[0].mxu1 %vm25_vm1, %v990_v33 }
 0x2ee   :  { %961 = vmatpush3.bf16.msra.mxu1 %v1098_v4  ;;  %918 = vmatprep.mubr.msk.f32.mxu1 %vm1064_vm0, %v1065_v5 }
 0x2ef   :  { %966 = vmatprep.subr.bf16.mxu1 %v965_v44 }
 0x3c0   :  { %v338_v35 = vpop.f32.mrb[0].mxu1 }
 0x3c1   :  { %v342_v36 = vadd.f32 %v338_v35, %v268_v34  ;;  %v906_v37 = vpop.f32.mrb[1].mxu1 }
 0x3c3   :  { %v833_v38 = vmul.f32 -1.442695, %v342_v36 }
 0x3c5   :  { %991 = vpow2.f32 %v833_v38 }
 0x3cf   :  { %v992_v39 = vpop.eup %991 }
 0x3d0   :  { %v346_v40 = vadd.f32 1.0, %v992_v39 }
 0x3d2   :  { %993 = vrcp.f32 %v346_v40 }
 0x3dc   :  { %v994_v41 = vpop.eup %993 }
 0x3dd   :  { %912 = vmatmul.mubr.msk.f32.vlgmr.msra.gmra.mrb[6].mxu0 %vm25_vm1, %v994_v41 }
 0x3de   :  { %964 = vmatpush3.bf16.msra.mxu0 %v1098_v4  ;;  %925 = vmatprep.mubr.msk.f32.mxu0 %vm1064_vm0, %v1065_v5 }
 0x4b0   :  { %v419_v46 = vpop.f32.mrb[6].mxu0 }
 0x4b1   :  { %v423_v47 = vadd.f32 %v419_v46, %v349_v45  ;;  %v913_v48 = vpop.f32.mrb[7].mxu0 }
 0x4b3   :  { %v835_v49 = vmul.f32 -1.442695, %v423_v47 }
 0x4b5   :  { %995 = vpow2.f32 %v835_v49 }
 0x4bf   :  { %v996_v50 = vpop.eup %995 }
 0x4c0   :  { %v427_v51 = vadd.f32 1.0, %v996_v50 }
 0x4c2   :  { %997 = vrcp.f32 %v427_v51 }
 0x4cc   :  { %v998_v52 = vpop.eup %997 }
 0x4cd   :  { %919 = vmatmul.mubr.msk.f32.vlgmr.msra.gmra.mrb[2].mxu1 %vm25_vm1, %v998_v52 }
 0x4ce   :  { %968 = vmatpush3.bf16.msra.mxu1 %v965_v44  ;;  %932 = vmatprep.mubr.msk.f32.mxu1 %vm25_vm1, %v1106_v9 }
 0x4d1   :  { %933 = vmatmul.mubr.msk.f32.vlgmr.msra.gmra.mrb[4].mxu1 %vm25_vm1, %v982_v17 }
 0x4d2   :  { %935 = vmatprep.mubr.msk.f32.mxu1 %vm25_vm1, %v986_v25 }
 0x4d5   :  { %936 = vmatmul.mubr.msk.f32.gmra.mrb[6].mxu1 %vm25_vm1, %v990_v33 }
 0x4d6   :  { %938 = vmatprep.mubr.msk.f32.mxu1 %vm25_vm1, %v994_v41 }
 0x4d9   :  { %939 = vmatmul.mubr.msk.f32.gmra.mrb[8].mxu1 %vm25_vm1, %v998_v52 }
 0x5a0   :  { %v500_v56 = vpop.f32.mrb[2].mxu1 }
 0x5a1   :  { %v504_v57 = vadd.f32 %v500_v56, %v430_v54  ;;  %v920_v58 = vpop.f32.mrb[3].mxu1 }
 0x5a3   :  { %v837_v59 = vmul.f32 -1.442695, %v504_v57 }
 0x5a4   :  { %v934_v60 = vpop.f32.mrb[4].mxu1 }
 0x5a5   :  { %999 = vpow2.f32 %v837_v59  ;;  %v1166_v61 = vsel %vm704_vm2, %v934_v60, -inf  ;;  %v663_v62 = vpop.f32.mrb[5].mxu1 }
 0x5a6   :  { %715 = vmax.xlane.f32.xlu0 %v1166_v61  ;;  %v1171_v0 = vsel %vm704_vm2, %v663_v62, -inf }
 0x5a8   :  { %v937_v63 = vpop.f32.mrb[6].mxu1 }
 0x5a9   :  { %v1175_v1 = vsel %vm704_vm2, %v937_v63, -inf  ;;  %v673_v2 = vpop.f32.mrb[7].mxu1 }
 0x5aa   :  { %713 = vmax.xlane.f32.xlu0 %v1171_v0  ;;  %719 = vmax.xlane.f32.xlu1 %v1175_v1  ;;  %v1181_v4 = vsel %vm704_vm2, %v673_v2, -inf }
 0x5ac   :  { %v940_v3 = vpop.f32.mrb[8].mxu1 }
 0x5ad   :  { %v683_v5 = vpop.f32.mrb[9].mxu1  ;;  %v1191_v9 = vsel %vm704_vm2, %v940_v3, -inf }
 0x5ae   :  { %v1185_v6 = vsel %vm704_vm2, %v683_v5, -inf  ;;  %717 = vmax.xlane.f32.xlu1 %v1181_v4 }
 0x5af   :  { %v1000_v7 = vpop.eup %999  ;;  %721 = vmax.xlane.f32.xlu0 %v1185_v6 }
 0x5b0   :  { %v508_v8 = vadd.f32 1.0, %v1000_v7 }
 0x5b2   :  { %1001 = vrcp.f32 %v508_v8  ;;  %723 = vmax.xlane.f32.xlu1 %v1191_v9 }
 0x5bc   :  { %v1002_v10 = vpop.eup %1001 }
 0x5bd   :  { %926 = vmatmul.mubr.msk.f32.vlgmr.msra.gmra.mrb[8].mxu0 %vm25_vm1, %v1002_v10  ;;  %941 = vmatprep.mubr.msk.f32.mxu1 %vm25_vm1, %v1002_v10 }
 0x633   :  { %v1200_v19 = vpop.xlane.xlu0 %715 }
 0x634   :  { %v730_v23 = vsub.f32 %v1166_v61, %v1200_v19 }
 0x636   :  { %v739_v25 = vmul.f32 1.442695, %v730_v23 }
 0x637   :  { %v1202_v20 = vpop.xlane.xlu1 %719  ;;  %v1204_v21 = vpop.xlane.xlu0 %713 }
 0x638   :  { %v729_v24 = vsub.f32 %v1171_v0, %v1204_v21  ;;  %v732_v26 = vsub.f32 %v1175_v1, %v1202_v20 }
 0x63a   :  { %v737_v27 = vmul.f32 1.442695, %v729_v24  ;;  %v743_v31 = vmul.f32 1.442695, %v732_v26 }
 0x63b   :  { %v1206_v22 = vpop.xlane.xlu1 %717 }
 0x63c   :  { %v731_v28 = vsub.f32 %v1181_v4, %v1206_v22  ;;  %v1218_v30 = vpop.xlane.xlu0 %721 }
 0x63d   :  { %v733_v34 = vsub.f32 %v1185_v6, %v1218_v30 }
 0x63e   :  { %v741_v33 = vmul.f32 1.442695, %v731_v28 }
 0x63f   :  { %v1216_v29 = vpop.xlane.xlu1 %723  ;;  %v745_v36 = vmul.f32 1.442695, %v733_v34 }
 0x640   :  { %v734_v32 = vsub.f32 %v1191_v9, %v1216_v29 }
 0x642   :  { %v747_v35 = vmul.f32 1.442695, %v734_v32 }
 0x690   :  { %v581_v12 = vpop.f32.mrb[8].mxu0 }
 0x691   :  { %v585_v13 = vadd.f32 %v581_v12, %v511_v11  ;;  %v927_v14 = vpop.f32.mrb[9].mxu0 }
 0x693   :  { %v839_v15 = vmul.f32 -1.442695, %v585_v13 }
 0x695   :  { %1003 = vpow2.f32 %v839_v15 }
 0x69f   :  { %v1004_v16 = vpop.eup %1003 }
 0x6a0   :  { %v589_v17 = vadd.f32 1.0, %v1004_v16 }
 0x6a2   :  { %1005 = vrcp.f32 %v589_v17 }
 0x6a3   :  { %1007 = vpow2.f32 %v739_v25 }
 0x6a4   :  { %1009 = vpow2.f32 %v737_v27 }
 0x6a5   :  { %1011 = vpow2.f32 %v743_v31 }
 0x6a6   :  { %1013 = vpow2.f32 %v741_v33 }
 0x6a7   :  { %1015 = vpow2.f32 %v747_v35 }
 0x6a8   :  { %1017 = vpow2.f32 %v745_v36 }
 0x6ac   :  { %v1006_v18 = vpop.eup %1005 }
 0x6ad   :  { %942 = vmatmul.mubr.msk.f32.gmra.mrb[10].mxu1 %vm25_vm1, %v1006_v18  ;;  %v1008_v41 = vpop.eup %1007 }
 0x6ae   :  { %v1010_v42 = vpop.eup %1009 }
 0x6af   :  { %v1012_v43 = vpop.eup %1011 }
 0x6b0   :  { %v1014_v44 = vpop.eup %1013 }
 0x6b1   :  { %v1016_v45 = vpop.eup %1015 }
 0x6b2   :  { %v1018_v46 = vpop.eup %1017 }
 0x780   :  { %v943_v37 = vpop.f32.mrb[10].mxu1 }
 0x781   :  { %v1226_v38 = vsel %vm704_vm2, %v943_v37, -inf  ;;  %v693_v39 = vpop.f32.mrb[11].mxu1 }
 0x782   :  { %v1230_v40 = vsel %vm704_vm2, %v693_v39, -inf  ;;  %727 = vmax.xlane.f32.xlu1 %v1226_v38 }
 0x783   :  { %725 = vmax.xlane.f32.xlu0 %v1230_v40 }
 0x786   :  { %755 = vadd.xlane.f32.xlu1 %v1008_v41 }
 0x787   :  { %753 = vadd.xlane.f32.xlu0 %v1010_v42 }
 0x78a   :  { %759 = vadd.xlane.f32.xlu1 %v1012_v43 }
 0x78b   :  { %757 = vadd.xlane.f32.xlu0 %v1014_v44 }
 0x78e   :  { %763 = vadd.xlane.f32.xlu1 %v1016_v45 }
 0x78f   :  { %761 = vadd.xlane.f32.xlu0 %v1018_v46 }
 0x80f   :  { %v728_v47 = vpop.xlane.xlu1 %727 }
 0x810   :  { %v736_v48 = vsub.f32 %v1226_v38, %v728_v47  ;;  %v1235_v49 = vpop.xlane.xlu0 %725 }
 0x811   :  { %v735_v50 = vsub.f32 %v1230_v40, %v1235_v49 }
 0x812   :  { %v751_v51 = vmul.f32 1.442695, %v736_v48 }
 0x813   :  { %v749_v52 = vmul.f32 1.442695, %v735_v50  ;;  %v756_v53 = vpop.xlane.xlu1 %755 }
 0x814   :  { %1019 = vpow2.f32 %v751_v51  ;;  %v754_v54 = vpop.xlane.xlu0 %753 }
 0x815   :  { %1021 = vpow2.f32 %v749_v52 }
 0x816   :  { %1023 = vlog2.f32 %v756_v53 }
 0x817   :  { %1025 = vlog2.f32 %v754_v54  ;;  %v760_v55 = vpop.xlane.xlu1 %759 }
 0x818   :  { %1027 = vlog2.f32 %v760_v55  ;;  %v758_v56 = vpop.xlane.xlu0 %757 }
 0x819   :  { %1029 = vlog2.f32 %v758_v56 }
 0x81b   :  { %v764_v57 = vpop.xlane.xlu1 %763 }
 0x81c   :  { %1031 = vlog2.f32 %v764_v57  ;;  %v762_v58 = vpop.xlane.xlu0 %761 }
 0x81d   :  { %1033 = vlog2.f32 %v762_v58 }
 0x81e   :  { %v1020_v59 = vpop.eup %1019 }
 0x81f   :  { %v1022_v60 = vpop.eup %1021  ;;  %767 = vadd.xlane.f32.xlu1 %v1020_v59 }
 0x820   :  { %v1024_v62 = vpop.eup %1023  ;;  %765 = vadd.xlane.f32.xlu0 %v1022_v60 }
 0x821   :  { %v1026_v63 = vpop.eup %1025  ;;  %v772_v2 = vmul.f32 0.6931472, %v1024_v62 }
 0x822   :  { %v1028_v3 = vpop.eup %1027  ;;  %v770_v5 = vmul.f32 0.6931472, %v1026_v63 }
 0x823   :  { %v1030_v7 = vpop.eup %1029  ;;  %v786_v8 = vadd.f32 %v772_v2, %v1200_v19  ;;  %v776_v10 = vmul.f32 0.6931472, %v1028_v3 }
 0x824   :  { %v785_v11 = vadd.f32 %v770_v5, %v1204_v21  ;;  %v774_v12 = vmul.f32 0.6931472, %v1030_v7 }
 0x825   :  { %v794_v13 = vsub.f32 %v1166_v61, %v786_v8  ;;  %v788_v14 = vadd.f32 %v776_v10, %v1202_v20 }
 0x826   :  { %v1032_v15 = vpop.eup %1031  ;;  %v793_v16 = vsub.f32 %v1171_v0, %v785_v11  ;;  %v787_v17 = vadd.f32 %v774_v12, %v1206_v22 }
 0x827   :  { %v1034_v18 = vpop.eup %1033  ;;  %802 = vst [vmem:[#allocation2 + $0x8] sm:$0xff] %v794_v13  ;;  %v796_v23 = vsub.f32 %v1175_v1, %v788_v14  ;;  %v780_v24 = vmul.f32 0.6931472, %v1032_v15 }
 0x828   :  { %801 = vst [vmem:[#allocation2] sm:$0xff] %v793_v16  ;;  %v795_v19 = vsub.f32 %v1181_v4, %v787_v17  ;;  %v778_v25 = vmul.f32 0.6931472, %v1034_v18 }
 0x829   :  { %804 = vst [vmem:[#allocation2 + $0x18] sm:$0xff] %v796_v23  ;;  %v790_v21 = vadd.f32 %v780_v24, %v1216_v29 }
 0x82a   :  { %803 = vst [vmem:[#allocation2 + $0x10] sm:$0xff] %v795_v19  ;;  %v789_v61 = vadd.f32 %v778_v25, %v1218_v30 }
 0x82b   :  { %v798_v20 = vsub.f32 %v1191_v9, %v790_v21 }
 0x82c   :  { %v797_v0 = vsub.f32 %v1185_v6, %v789_v61 }
 0x82d   :  { %806 = vst [vmem:[#allocation2 + $0x28] sm:$0xff] %v798_v20 }
 0x82e   :  { %805 = vst [vmem:[#allocation2 + $0x20] sm:$0xff] %v797_v0 }
 0x8ac   :  { %v768_v22 = vpop.xlane.xlu1 %767 }
 0x8ad   :  { %1035 = vlog2.f32 %v768_v22  ;;  %v766_v1 = vpop.xlane.xlu0 %765 }
 0x8ae   :  { %1037 = vlog2.f32 %v766_v1 }
 0x8b7   :  { %v1036_v26 = vpop.eup %1035 }
 0x8b8   :  { %v1038_v27 = vpop.eup %1037  ;;  %v784_v4 = vmul.f32 0.6931472, %v1036_v26 }
 0x8b9   :  { %v782_v28 = vmul.f32 0.6931472, %v1038_v27 }
 0x8ba   :  { %v792_v31 = vadd.f32 %v784_v4, %v728_v47 }
 0x8bb   :  { %v791_v29 = vadd.f32 %v782_v28, %v1235_v49 }
 0x8bc   :  { %v800_v30 = vsub.f32 %v1226_v38, %v792_v31 }
 0x8bd   :  { %v799_v9 = vsub.f32 %v1230_v40, %v791_v29 }
 0x8be   :  { %808 = vst [vmem:[#allocation2 + $0x38] sm:$0xff] %v800_v30 }
 0x8bf   :  { %807 = vst [vmem:[#allocation2 + $0x30] sm:$0xff] %v799_v9 }
 0x8c0   :  { %1050 = shalt.err (!%p1047_p4)
}
 0x8c1   :  { %s1051_s11 = scalar_lea.hbm %s1269_s3, 1024 }
 0x8c2   :  { %p1052_p5 = scmp.ne.s32.totalorder %s1269_s3, %s1051_s11  ;;  %p1055_p6 = scmp.lt.u32.totalorder %s1051_s11, %s1269_s3 }
 0x8c4   :  { %p1057_p7 = pnand %p1055_p6, %p1052_p5 }
 0x8c6   :  { %1060 = shalt.err (!%p1057_p7)
}
 0x8c7   :  { %s1067_s16 = smov 128   ;;  %s1068_s17 = smov 8  }
 0x8c8   :  { %820 = dma.vmem_to_hbm [thread:$0]  %s815_s7, 1024, %s1269_s3, [#allocation3], %s1067_s16, %s1067_s16, %s1068_s17  }
 0x8c9   :  { %1061 = dma.done.wait [#allocation3], 1024  }
 0x8ca   :  { %1062 = vsyncadd [#allocation3], 4294966272 }
 0x8cb   :  { %824 = vsyncpa [#allocation3], 1 }

</bundles_post_ra>
